<compile_context>
chip_gen: v6e
topology: v6e:2x2x1
jax: 0.10.0
libtpu: 0.0.40
codegen_flags: <defaults>
</compile_context>

<pallas_src>
import numpy as np
import jax
import jax.numpy as jnp
from jax.experimental import pallas as pl
from jax.experimental.pallas import tpu as pltpu

# ---- module hyper-parameters (BlazeMultiBoxLoss.__init__) -------------------
NUM_CLASSES = 2
OVERLAP_THRESH = 0.35
NEGPOS_RATIO = 3
VARIANCE = (0.1, 0.2)          # cfg['variance']

LANE = 128


# ---- matching utilities (glue: tiny num_objs, targets built channel-minor) --
def point_form(boxes):
    return jnp.concatenate([boxes[:, :2] - boxes[:, 2:] / 2.0,
                            boxes[:, :2] + boxes[:, 2:] / 2.0], axis=1)


def jaccard(box_a, box_b):
    max_xy = jnp.minimum(box_a[:, None, 2:], box_b[None, :, 2:])
    min_xy = jnp.maximum(box_a[:, None, :2], box_b[None, :, :2])
    wh = jnp.maximum(max_xy - min_xy, 0.0)
    inter = wh[..., 0] * wh[..., 1]
    area_a = ((box_a[:, 2] - box_a[:, 0]) * (box_a[:, 3] - box_a[:, 1]))[:, None]
    area_b = ((box_b[:, 2] - box_b[:, 0]) * (box_b[:, 3] - box_b[:, 1]))[None, :]
    return inter / (area_a + area_b - inter)


def encode_cm(matched_cm, priors_cm, variances):
    # matched_cm: (4, P) point-form; priors_cm: (4, P) center-form -> (4, P)
    ctr = (matched_cm[:2] + matched_cm[2:]) * 0.5
    g_cxcy = (ctr - priors_cm[:2]) / (variances[0] * priors_cm[2:])
    g_wh = jnp.log((matched_cm[2:] - matched_cm[:2]) / priors_cm[2:]) / variances[1]
    return jnp.concatenate([g_cxcy, g_wh], axis=0)


def encode_landm_cm(matched_cm, priors_cm, variances):
    # matched_cm: (10, P) = [x0,y0,x1,y1,...]; priors_cm: (4, P) -> (10, P)
    num_priors = matched_cm.shape[-1]
    m = matched_cm.reshape(5, 2, num_priors)
    g = (m - priors_cm[None, :2, :]) / (variances[0] * priors_cm[None, 2:, :])
    return g.reshape(10, num_priors)


def match1_cm(threshold, truths, priors, priors_cm, variances, labels, landmarks):
    num_objs = truths.shape[0]
    overlaps = jaccard(truths, point_form(priors))          # (num_objs, P)
    best_prior_idx = jnp.argmax(overlaps, axis=1)           # (num_objs,)
    best_truth_overlap = jnp.max(overlaps, axis=0)          # (P,)
    best_truth_idx = jnp.argmax(overlaps, axis=0)           # (P,)
    best_truth_overlap = best_truth_overlap.at[best_prior_idx].set(2.0)
    for j in range(num_objs):                               # static tiny loop
        best_truth_idx = best_truth_idx.at[best_prior_idx[j]].set(j)
    matches_cm = truths.T[:, best_truth_idx]                # (4, P)
    conf = labels[best_truth_idx] + 1.0                     # labels are all 0
    conf = jnp.where(best_truth_overlap < threshold, 0.0, conf)
    loc_cm = encode_cm(matches_cm, priors_cm, variances)                      # (4, P)
    landm_cm = encode_landm_cm(landmarks.T[:, best_truth_idx], priors_cm,
                               variances)                                      # (10, P)
    return loc_cm, conf, landm_cm


# ---- Pallas kernel: per-prior losses -----------------------------------------
def _loss_kernel(confp_ref, lall_ref, conft_ref, loct_ref, landt_ref,
                 ce_ref, lloc_ref, lland_ref):
    # matched class id and positive mask -- (1, Pt)
    conf_t = conft_ref[0]                               # (1, Pt) f32
    pos = conf_t > 0.0

    # 2-class cross entropy per prior:
    #   logsumexp(c0, c1) - c_target == softplus(c_other - c_target)
    cp = confp_ref[0].astype(jnp.float32)               # (2, Pt)
    c0 = cp[0:1, :]
    c1 = cp[1:2, :]
    diff = jnp.where(pos, c0 - c1, c1 - c0)
    ce_ref[0] = jnp.maximum(diff, 0.0) + jnp.log1p(jnp.exp(-jnp.abs(diff)))

    # SmoothL1(pred, target), reduction='none', masked to positives.
    # jnp.where (not multiply) keeps NaN from degenerate negative matches out.
    preds = lall_ref[0].astype(jnp.float32)             # (16, Pt): landm 0:10, loc 12:16

    def smooth_l1(p, t):
        d = p - t
        ad = jnp.abs(d)
        return jnp.where(ad < 1.0, 0.5 * d * d, ad - 0.5)

    lloc_ref[0] = jnp.where(
        pos, smooth_l1(preds[12:16, :], loct_ref[0].astype(jnp.float32)), 0.0)
    lland_ref[0] = jnp.where(
        pos, smooth_l1(preds[0:10, :], landt_ref[0].astype(jnp.float32)), 0.0)


def _per_prior_losses(confp_t, lall_t, conft, loct, landt, prior_tile):
    num, _, padded_p = lall_t.shape
    grid = (num, padded_p // prior_tile)

    def spec(c):
        return pl.BlockSpec((1, c, prior_tile), lambda b, p: (b, 0, p))

    return pl.pallas_call(
        _loss_kernel,
        out_shape=(jax.ShapeDtypeStruct((num, 1, padded_p), jnp.float32),
                   jax.ShapeDtypeStruct((num, 4, padded_p), jnp.float32),
                   jax.ShapeDtypeStruct((num, 10, padded_p), jnp.float32)),
        grid=grid,
        in_specs=[spec(2), spec(16), spec(1), spec(4), spec(10)],
        out_specs=(spec(1), spec(4), spec(10)),
        compiler_params=pltpu.CompilerParams(
            dimension_semantics=("parallel", "parallel"),
            vmem_limit_bytes=32 * 1024 * 1024),
    )(confp_t, lall_t, conft, loct, landt)


def _pad_last(x, padded_p):
    pad = padded_p - x.shape[-1]
    if pad == 0:
        return x
    return jnp.pad(x, [(0, 0)] * (x.ndim - 1) + [(0, pad)])


# ---- forward (mirrors BlazeMultiBoxLoss.forward) ------------------------------
def blaze_multibox_loss(loc_data1, conf_data, priors, targets):
    num, num_priors = loc_data1.shape[0], loc_data1.shape[1]
    priors = priors[:num_priors]
    priors_cm = priors.T                                      # (4, P)

    # GT <-> prior matching; emit targets channel-minor (no extra transpose pass).
    def match_one(t):
        labels = jnp.zeros((t.shape[0],), jnp.float32)        # label_test: all labels 0
        return match1_cm(OVERLAP_THRESH, t[:, 10:14], priors, priors_cm,
                         VARIANCE, labels, t[:, :10])

    loct_cm, conf_t, landt_cm = jax.vmap(match_one)(targets)  # (B,4,P),(B,P),(B,10,P)

    # Lane-dense, bf16 prediction refs (single fused transpose+cast each).
    confp_t = jnp.transpose(conf_data, (0, 2, 1)).astype(jnp.bfloat16)   # (B, 2, P)
    lall_t = jnp.transpose(loc_data1, (0, 2, 1)).astype(jnp.bfloat16)    # (B,16, P)
    conft = conf_t[:, None, :].astype(jnp.float32)                        # (B, 1, P)
    loct_b = loct_cm.astype(jnp.bfloat16)
    landt_b = landt_cm.astype(jnp.bfloat16)

    # Prior-axis tiling: pad to a multiple of the (128-multiple) tile so every
    # store is an unmasked dense vst; padded priors have conf_t == 0.
    if num_priors >= 1024:
        prior_tile = 1024
    else:
        prior_tile = ((num_priors + LANE - 1) // LANE) * LANE
    padded_p = ((num_priors + prior_tile - 1) // prior_tile) * prior_tile

    confp_t = _pad_last(confp_t, padded_p)
    lall_t = _pad_last(lall_t, padded_p)
    conft = _pad_last(conft, padded_p)
    loct_b = _pad_last(loct_b, padded_p)
    landt_b = _pad_last(landt_b, padded_p)

    ce_out, lloc_out, lland_out = _per_prior_losses(
        confp_t, lall_t, conft, loct_b, landt_b, prior_tile)

    # Slice padded priors back off before mining / reductions.
    ce = ce_out[:, 0, :num_priors]                            # (B, P)
    loss_l_pp = lloc_out[:, :, :num_priors]                   # (B, 4, P)
    loss_land_pp = lland_out[:, :, :num_priors]               # (B, 10, P)
    pos = conf_t > 0                                          # (B, P)

    # Hard negative mining: one argsort + scatter (exactly the reference's
    # argsort(argsort()) ranking, minus one full sort).
    # TODO(synk): at production prior counts replace the full argsort with a
    # lax.top_k / per-row-threshold selection; the sort dominates wall time there.
    loss_c_mine = jnp.where(pos, 0.0, ce)
    loss_idx = jnp.argsort(-loss_c_mine, axis=1)
    num_pos = jnp.sum(pos.astype(jnp.int32), axis=1, keepdims=True)
    num_neg = jnp.minimum(NEGPOS_RATIO * num_pos, num_priors - 1)
    ranks = jnp.arange(num_priors)[None, :]
    batch_idx = jnp.arange(num)[:, None]
    neg = jnp.zeros((num, num_priors), jnp.bool_).at[batch_idx, loss_idx].set(
        ranks < num_neg)
    sel = jnp.logical_or(pos, neg)

    # F.cross_entropy (mean over selected rows), then /= N -- same double
    # normalization as the reference module.
    n_sel = jnp.sum(sel.astype(jnp.float32))
    N = jnp.sum(num_pos).astype(jnp.float32)
    loss_c = jnp.sum(jnp.where(sel, ce, 0.0)) / n_sel / N

    return loss_l_pp, loss_land_pp, loss_c, pos, N


if __name__ == "__main__":
    key = jax.random.PRNGKey(0)
    num, num_priors, num_objs = 2, 256, 3
    k1, k2, k3, k4, k5, k6, k7 = jax.random.split(key, 7)

    # predictions
    loc_data1 = 0.5 * jax.random.normal(k1, (num, num_priors, 16), jnp.float32)
    conf_data = jax.random.normal(k2, (num, num_priors, NUM_CLASSES), jnp.float32)
    # priors in center form (cx, cy, w, h)
    prior_cxy = jax.random.uniform(k3, (num_priors, 2), minval=0.05, maxval=0.95)
    prior_wh = jax.random.uniform(k4, (num_priors, 2), minval=0.10, maxval=0.30)
    priors = jnp.concatenate([prior_cxy, prior_wh], axis=1)
    # targets: [10 landmark coords | point-form box (xmin,ymin,xmax,ymax)]
    lms = jax.random.uniform(k5, (num, num_objs, 10))
    box_min = jax.random.uniform(k6, (num, num_objs, 2), minval=0.05, maxval=0.55)
    box_wh = jax.random.uniform(k7, (num, num_objs, 2), minval=0.15, maxval=0.40)
    boxes = jnp.concatenate([box_min, box_min + box_wh], axis=-1)
    targets = jnp.concatenate([lms, boxes], axis=-1)

    outs = jax.jit(blaze_multibox_loss)(loc_data1, conf_data, priors, targets)
    loss_l_pp, loss_land_pp, loss_c, pos, N = jax.block_until_ready(outs)

    # Host: PyTorch's data-dependent `tensor[pos_idx].view(-1, k)` compaction + /N.
    pos_np = np.asarray(pos)
    N_np = float(N)
    loss_l = np.transpose(np.asarray(loss_l_pp), (0, 2, 1))[pos_np] / N_np      # (total_pos, 4)
    loss_land = np.transpose(np.asarray(loss_land_pp), (0, 2, 1))[pos_np] / N_np  # (total_pos, 10)
    loss_c = float(loss_c)

    assert pos_np.sum() > 0
    assert loss_l.shape[1] == 4 and loss_land.shape[1] == 10
    assert np.isfinite(loss_l).all() and np.isfinite(loss_land).all()
    assert np.isfinite(loss_c)
    print("KERNEL_OK")
</pallas_src>

<mosaic_0001>
module attributes {stable_mosaic.version = 11 : i64} {
  func.func @_loss_kernel(%arg0: i32, %arg1: i32, %arg2: memref<1x2x256xbf16, #tpu.memory_space<vmem>>, %arg3: memref<1x16x256xbf16, #tpu.memory_space<vmem>>, %arg4: memref<1x1x256xf32, #tpu.memory_space<vmem>>, %arg5: memref<1x4x256xbf16, #tpu.memory_space<vmem>>, %arg6: memref<1x10x256xbf16, #tpu.memory_space<vmem>>, %arg7: memref<1x1x256xf32, #tpu.memory_space<vmem>>, %arg8: memref<1x4x256xf32, #tpu.memory_space<vmem>>, %arg9: memref<1x10x256xf32, #tpu.memory_space<vmem>>) attributes {dimension_semantics = [#tpu.dimension_semantics<parallel>, #tpu.dimension_semantics<parallel>], iteration_bounds = array<i64: 2, 1>, scalar_prefetch = 0 : i64, scratch_operands = 0 : i64, tpu.core_type = #tpu.core_type<tc>, window_params = [{transform_indices = @transform_0, window_bounds = array<i64: 1, 2, 256>}, {transform_indices = @transform_1, window_bounds = array<i64: 1, 16, 256>}, {transform_indices = @transform_2, window_bounds = array<i64: 1, 1, 256>}, {transform_indices = @transform_3, window_bounds = array<i64: 1, 4, 256>}, {transform_indices = @transform_4, window_bounds = array<i64: 1, 10, 256>}, {transform_indices = @transform_5, window_bounds = array<i64: 1, 1, 256>}, {transform_indices = @transform_6, window_bounds = array<i64: 1, 4, 256>}, {transform_indices = @transform_7, window_bounds = array<i64: 1, 10, 256>}]} {
    %c0 = arith.constant 0 : index
    %c0_0 = arith.constant 0 : index
    %c0_1 = arith.constant 0 : index
    %0 = vector.load %arg4[%c0, %c0_0, %c0_1] : memref<1x1x256xf32, #tpu.memory_space<vmem>>, vector<1x1x256xf32>
    %1 = vector.shape_cast %0 : vector<1x1x256xf32> to vector<1x256xf32>
    %cst = arith.constant 0.000000e+00 : f32
    %2 = vector.broadcast %cst : f32 to vector<1x256xf32>
    %3 = arith.cmpf ogt, %1, %2 : vector<1x256xf32>
    %c0_2 = arith.constant 0 : index
    %c0_3 = arith.constant 0 : index
    %c0_4 = arith.constant 0 : index
    %4 = vector.load %arg2[%c0_2, %c0_3, %c0_4] : memref<1x2x256xbf16, #tpu.memory_space<vmem>>, vector<1x2x256xbf16>
    %5 = vector.shape_cast %4 : vector<1x2x256xbf16> to vector<2x256xbf16>
    %6 = arith.extf %5 : vector<2x256xbf16> to vector<2x256xf32>
    %7 = vector.extract_strided_slice %6 {offsets = [0, 0], sizes = [1, 256], strides = [1, 1]} : vector<2x256xf32> to vector<1x256xf32>
    %8 = vector.extract_strided_slice %6 {offsets = [1, 0], sizes = [1, 256], strides = [1, 1]} : vector<2x256xf32> to vector<1x256xf32>
    %9 = arith.subf %7, %8 : vector<1x256xf32>
    %10 = arith.subf %8, %7 : vector<1x256xf32>
    %11 = arith.select %3, %9, %10 : vector<1x256xi1>, vector<1x256xf32>
    %cst_5 = arith.constant 0.000000e+00 : f32
    %12 = vector.broadcast %cst_5 : f32 to vector<1x256xf32>
    %13 = arith.maximumf %11, %12 : vector<1x256xf32>
    %14 = math.absf %11 : vector<1x256xf32>
    %cst_6 = arith.constant 0.000000e+00 : f32
    %15 = vector.broadcast %cst_6 : f32 to vector<1x256xf32>
    %16 = arith.subf %15, %14 : vector<1x256xf32>
    %17 = math.exp %16 : vector<1x256xf32>
    %18 = math.log1p %17 : vector<1x256xf32>
    %19 = arith.addf %13, %18 : vector<1x256xf32>
    %c0_7 = arith.constant 0 : index
    %c0_8 = arith.constant 0 : index
    %c0_9 = arith.constant 0 : index
    %20 = vector.load %arg7[%c0_7, %c0_8, %c0_9] : memref<1x1x256xf32, #tpu.memory_space<vmem>>, vector<1x1x256xf32>
    %21 = vector.shape_cast %20 : vector<1x1x256xf32> to vector<1x256xf32>
    %22 = vector.shape_cast %19 : vector<1x256xf32> to vector<1x1x256xf32>
    tpu.vector_store %arg7[%c0_7, %c0_8, %c0_9], %22 {strides = array<i32>} : memref<1x1x256xf32, #tpu.memory_space<vmem>>, vector<1x1x256xf32>,
    %c0_10 = arith.constant 0 : index
    %c0_11 = arith.constant 0 : index
    %c0_12 = arith.constant 0 : index
    %23 = vector.load %arg3[%c0_10, %c0_11, %c0_12] : memref<1x16x256xbf16, #tpu.memory_space<vmem>>, vector<1x16x256xbf16>
    %24 = vector.shape_cast %23 : vector<1x16x256xbf16> to vector<16x256xbf16>
    %25 = arith.extf %24 : vector<16x256xbf16> to vector<16x256xf32>
    %26 = vector.extract_strided_slice %25 {offsets = [12, 0], sizes = [4, 256], strides = [1, 1]} : vector<16x256xf32> to vector<4x256xf32>
    %c0_13 = arith.constant 0 : index
    %c0_14 = arith.constant 0 : index
    %c0_15 = arith.constant 0 : index
    %27 = vector.load %arg5[%c0_13, %c0_14, %c0_15] : memref<1x4x256xbf16, #tpu.memory_space<vmem>>, vector<1x4x256xbf16>
    %28 = vector.shape_cast %27 : vector<1x4x256xbf16> to vector<4x256xbf16>
    %29 = arith.extf %28 : vector<4x256xbf16> to vector<4x256xf32>
    %30 = arith.subf %26, %29 : vector<4x256xf32>
    %31 = math.absf %30 : vector<4x256xf32>
    %cst_16 = arith.constant 1.000000e+00 : f32
    %32 = vector.broadcast %cst_16 : f32 to vector<4x256xf32>
    %33 = arith.cmpf olt, %31, %32 : vector<4x256xf32>
    %cst_17 = arith.constant 5.000000e-01 : f32
    %34 = vector.broadcast %cst_17 : f32 to vector<4x256xf32>
    %35 = arith.mulf %34, %30 : vector<4x256xf32>
    %36 = arith.mulf %35, %30 : vector<4x256xf32>
    %cst_18 = arith.constant 5.000000e-01 : f32
    %37 = vector.broadcast %cst_18 : f32 to vector<4x256xf32>
    %38 = arith.subf %31, %37 : vector<4x256xf32>
    %39 = arith.select %33, %36, %38 : vector<4x256xi1>, vector<4x256xf32>
    %cst_19 = arith.constant 0.000000e+00 : f32
    %40 = vector.shape_cast %3 : vector<1x256xi1> to vector<1x256xi1>
    %41 = vector.broadcast %40 : vector<1x256xi1> to vector<4x256xi1>
    %42 = vector.broadcast %cst_19 : f32 to vector<4x256xf32>
    %43 = arith.select %41, %39, %42 : vector<4x256xi1>, vector<4x256xf32>
    %c0_20 = arith.constant 0 : index
    %c0_21 = arith.constant 0 : index
    %c0_22 = arith.constant 0 : index
    %44 = vector.load %arg8[%c0_20, %c0_21, %c0_22] : memref<1x4x256xf32, #tpu.memory_space<vmem>>, vector<1x4x256xf32>
    %45 = vector.shape_cast %44 : vector<1x4x256xf32> to vector<4x256xf32>
    %46 = vector.shape_cast %43 : vector<4x256xf32> to vector<1x4x256xf32>
    tpu.vector_store %arg8[%c0_20, %c0_21, %c0_22], %46 {strides = array<i32>} : memref<1x4x256xf32, #tpu.memory_space<vmem>>, vector<1x4x256xf32>,
    %47 = vector.extract_strided_slice %25 {offsets = [0, 0], sizes = [10, 256], strides = [1, 1]} : vector<16x256xf32> to vector<10x256xf32>
    %c0_23 = arith.constant 0 : index
    %c0_24 = arith.constant 0 : index
    %c0_25 = arith.constant 0 : index
    %48 = vector.load %arg6[%c0_23, %c0_24, %c0_25] : memref<1x10x256xbf16, #tpu.memory_space<vmem>>, vector<1x10x256xbf16>
    %49 = vector.shape_cast %48 : vector<1x10x256xbf16> to vector<10x256xbf16>
    %50 = arith.extf %49 : vector<10x256xbf16> to vector<10x256xf32>
    %51 = arith.subf %47, %50 : vector<10x256xf32>
    %52 = math.absf %51 : vector<10x256xf32>
    %cst_26 = arith.constant 1.000000e+00 : f32
    %53 = vector.broadcast %cst_26 : f32 to vector<10x256xf32>
    %54 = arith.cmpf olt, %52, %53 : vector<10x256xf32>
    %cst_27 = arith.constant 5.000000e-01 : f32
    %55 = vector.broadcast %cst_27 : f32 to vector<10x256xf32>
    %56 = arith.mulf %55, %51 : vector<10x256xf32>
    %57 = arith.mulf %56, %51 : vector<10x256xf32>
    %cst_28 = arith.constant 5.000000e-01 : f32
    %58 = vector.broadcast %cst_28 : f32 to vector<10x256xf32>
    %59 = arith.subf %52, %58 : vector<10x256xf32>
    %60 = arith.select %54, %57, %59 : vector<10x256xi1>, vector<10x256xf32>
    %cst_29 = arith.constant 0.000000e+00 : f32
    %61 = vector.shape_cast %3 : vector<1x256xi1> to vector<1x256xi1>
    %62 = vector.broadcast %61 : vector<1x256xi1> to vector<10x256xi1>
    %63 = vector.broadcast %cst_29 : f32 to vector<10x256xf32>
    %64 = arith.select %62, %60, %63 : vector<10x256xi1>, vector<10x256xf32>
    %c0_30 = arith.constant 0 : index
    %c0_31 = arith.constant 0 : index
    %c0_32 = arith.constant 0 : index
    %65 = vector.load %arg9[%c0_30, %c0_31, %c0_32] : memref<1x10x256xf32, #tpu.memory_space<vmem>>, vector<1x10x256xf32>
    %66 = vector.shape_cast %65 : vector<1x10x256xf32> to vector<10x256xf32>
    %67 = vector.shape_cast %64 : vector<10x256xf32> to vector<1x10x256xf32>
    tpu.vector_store %arg9[%c0_30, %c0_31, %c0_32], %67 {strides = array<i32>} : memref<1x10x256xf32, #tpu.memory_space<vmem>>, vector<1x10x256xf32>,
    return
  }
  func.func @transform_0(%arg0: i32, %arg1: i32) -> (i32, i32, i32) {
    %c0_i32 = arith.constant 0 : i32
    %c0_i32_0 = arith.constant 0 : i32
    return %arg0, %c0_i32, %arg1 : i32, i32, i32
  }
  func.func @transform_1(%arg0: i32, %arg1: i32) -> (i32, i32, i32) {
    %c0_i32 = arith.constant 0 : i32
    %c0_i32_0 = arith.constant 0 : i32
    return %arg0, %c0_i32, %arg1 : i32, i32, i32
  }
  func.func @transform_2(%arg0: i32, %arg1: i32) -> (i32, i32, i32) {
    %c0_i32 = arith.constant 0 : i32
    %c0_i32_0 = arith.constant 0 : i32
    return %arg0, %c0_i32, %arg1 : i32, i32, i32
  }
  func.func @transform_3(%arg0: i32, %arg1: i32) -> (i32, i32, i32) {
    %c0_i32 = arith.constant 0 : i32
    %c0_i32_0 = arith.constant 0 : i32
    return %arg0, %c0_i32, %arg1 : i32, i32, i32
  }
  func.func @transform_4(%arg0: i32, %arg1: i32) -> (i32, i32, i32) {
    %c0_i32 = arith.constant 0 : i32
    %c0_i32_0 = arith.constant 0 : i32
    return %arg0, %c0_i32, %arg1 : i32, i32, i32
  }
  func.func @transform_5(%arg0: i32, %arg1: i32) -> (i32, i32, i32) {
    %c0_i32 = arith.constant 0 : i32
    %c0_i32_0 = arith.constant 0 : i32
    return %arg0, %c0_i32, %arg1 : i32, i32, i32
  }
  func.func @transform_6(%arg0: i32, %arg1: i32) -> (i32, i32, i32) {
    %c0_i32 = arith.constant 0 : i32
    %c0_i32_0 = arith.constant 0 : i32
    return %arg0, %c0_i32, %arg1 : i32, i32, i32
  }
  func.func @transform_7(%arg0: i32, %arg1: i32) -> (i32, i32, i32) {
    %c0_i32 = arith.constant 0 : i32
    %c0_i32_0 = arith.constant 0 : i32
    return %arg0, %c0_i32, %arg1 : i32, i32, i32
  }
}

</mosaic_0001>

<bundles_post_ra>
// kernel: blaze_multibox_loss.1
= control target key start
LH: loop header
LB: loop body
LE: loop exit
PB: predicated region body
PF: predicated region fallthrough
CT: control target
= control target key end

     0   :  { %13 = vsyncpa [#allocation3], 0  ;;  %s1314_s0 = inlined_call_operand.vmem [shape: bf16[2,2,256], index: 0, kind: input, shape index: {}]   ;;  %s1315_s1 = inlined_call_operand.vmem [shape: bf16[2,16,256], index: 1, kind: input, shape index: {}]   ;;  %s1316_s2 = inlined_call_operand.vmem [shape: f32[2,1,256], index: 2, kind: input, shape index: {}]   ;;  %s1317_s3 = inlined_call_operand.vmem [shape: bf16[2,4,256], index: 3, kind: input, shape index: {}]   ;;  %s1318_s4 = inlined_call_operand.vmem [shape: bf16[2,10,256], index: 4, kind: input, shape index: {}]   ;;  %s1319_s5 = inlined_call_operand.vmem [shape: f32[2,1,256], index: 5, kind: output, shape index: {0}]   ;;  %s1320_s6 = inlined_call_operand.hbm [shape: f32[2,4,256], index: 6, kind: output, shape index: {1}]   ;;  %s1321_s7 = inlined_call_operand.vmem [shape: f32[2,10,256], index: 7, kind: output, shape index: {2}]  }
   0x1   :  { %15 = vsyncpa [#allocation3 + $0x1], 0  ;;  %s1095_s24 = smov 0   ;;  %s1097_s25 = smov 0  }
   0x2   :  { %s1099_s26 = smov 0   ;;  %s1101_s27 = smov 0  }
   0x3   :  { %s1103_s28 = smov 0   ;;  %s1105_s29 = smov 0  }
   0x4 LB: > { %1324 = sst [smem:[#allocation5_spill]] %s1046_s28  ;;  %s880_s30 = sadd.s32 4294967295, %s1050_s29   ;;  %s1050_s29 = sphi %s1105_s29, %s21_s29   ;;  %s1046_s28 = sphi %s1103_s28, %s1337_s28   ;;  %s1042_s27 = sphi %s1101_s27, %s1336_s27   ;;  %s1038_s26 = sphi %s1099_s26, %s1340_s26   ;;  %s1034_s25 = sphi %s1097_s25, %s1339_s25   ;;  %s1030_s24 = sphi %s1095_s24, %s1338_s24  }
   0x5   : > { %s881_s8 = sadd.s32 4294967294, %s1050_s29   ;;  %s33_s9 = sadd.s32 1, %s1046_s28 }
   0x6   : > { %s210_s10 = sadd.s32 1, %s1038_s26  ;;  %p35_p0 = scmp.ge.s32.totalorder %s33_s9, 2 }
   0x7   : > { %p220_p1 = scmp.ne.s32.totalorder %s1038_s26, %s1034_s25  ;;  %p221_p2 = scmp.eq.s32.totalorder %s880_s30, 1 }
   0x8   : > { %p226_p3 = scmp.ne.s32.totalorder %s1034_s25, %s1030_s24  ;;  %s1342_s9 = smov (%p35_p0, %s33_s9), 0 }
   0x9   : > { %1325 = sst [smem:[#allocation6_spill]] %s1342_s9  ;;  %p1135_p4 = por %p221_p2, %p220_p1 }
   0xa   : > { %p227_p5 = scmp.eq.s32.totalorder %s881_s8, 1  ;;  %s205_s12 = ssub.s32 %s1046_s28, %s1342_s9 }
   0xb   : > { %p884_p6 = scmp.ge.s32.totalorder %s1050_s29, 1  ;;  %p208_p7 = scmp.eq.s32.totalorder %s205_s12, 0 }
   0xc   : > { %p1142_p8 = por %p227_p5, %p226_p3  ;;  %p336_p9 = scmp.lt.s32.totalorder %s1050_s29, 3 }
   0xd   : > { %s1148_s14 = scalar_select %p208_p7, %s1038_s26, %s210_s10  }
   0xe   : > { %p337_p10 = pnand %p884_p6, %p336_p9 }
   0xf   : > { %p424_p11 = scmp.lt.s32.totalorder (!%p337_p10), %s1042_s27, 1 }
  0x10   : > { %340 = sbr.rel (%p337_p10) target bundleno = 92 (0x5c), region = 40 }
  0x15   : > { %v506_v0 = vlaneseq  ;;  %v1052_v1 = vmov 1966171168   ;;  %s1152_s15 = scalar_select %p424_p11, %s1042_s27, 1  ;;  %v1053_v19 = vmov 0  }
  0x16   : > { %v504_v2 = vunpack.c.l.s4 %v1052_v1 }
  0x17   : > { %v507_v3 = vshrl.u32 %v506_v0, 7  ;;  %s1156_s16 = sshll.u32 %s1152_s15, 1  ;;  %s908_s17 = sshll.u32 %s1152_s15, 4 }
  0x18   : > { %v505_v4 = vunpack.c.0.s8 %v504_v2  ;;  %s430_s20 = scalar_lea.vmem %s1314_s0, %s1156_s16  ;;  %s440_s23 = scalar_lea.vmem %s1315_s1, %s908_s17 }
  0x19   : > { %v570_v5 = vsub.s32 0, %v507_v3  ;;  %s449_s10 = scalar_lea.vmem %s1316_s2, %s1156_s16  ;;  %s909_s12 = sshll.u32 %s1152_s15, 2  ;;  %v493_v6 = vld [vmem:[%s430_s20] sm:$0x3]  ;;  %v1171_v7 = vld [vmem:[%s440_s23 + $0x8] sm:$0xff]  ;;  %v574_v8 = vsub.s32 1, %v507_v3 }
  0x1a   : > { %v542_v9 = vld [vmem:[%s440_s23] sm:$0xff]  ;;  %s459_s18 = scalar_lea.vmem %s1317_s3, %s909_s12  ;;  %v494_v11 = vunpack.c.l.bf16 %v493_v6  ;;  %v547_v12 = vunpack.c.h.bf16 %v1171_v7  ;;  %v508_v14 = vsub.s32 %v505_v4, %v507_v3  ;;  %s1180_s22 = scalar_lea.vmem %s1318_s4, %s908_s17  ;;  %v546_v17 = vunpack.c.l.bf16 %v1171_v7 }
  0x1b   : > { %v491_v10 = vld [vmem:[%s449_s10] sm:$0x3]  ;;  %v544_v15 = vunpack.c.l.bf16 %v542_v9  ;;  %v545_v16 = vunpack.c.h.bf16 %v542_v9  ;;  %s409_s20 = sand.u32 1, %s1034_s25   ;;  %s911_s9 = sshll.u32 %s1152_s15, 5  ;;  %v586_v56 = vld [vmem:[%s1180_s22 + $0x8] sm:$0x11] }
  0x1c   : > { %vm492_vm0 = vcmp.gt.f32.partialorder %v491_v10, 0.0  ;;  %v548_v13 = vld [vmem:[%s459_s18] sm:$0xf]  ;;  %v496_v21 = vrot.slane %v494_v11, 7  ;;  %s1194_s28 = sshll.u32 %s409_s20, 3  ;;  %s912_s15 = sshll.u32 %s1042_s27, 7 }
  0x1d   : > { %v549_v18 = vunpack.c.l.bf16 %v548_v13  ;;  %v567_v20 = vsel %vm492_vm0, 1, %v1053_v19  ;;  %v585_v22 = vld [vmem:[%s1180_s22] sm:$0xff]  ;;  %s411_s17 = scalar_lea.vmem [#allocation2], %s1194_s28  ;;  %s1229_s10 = scalar_lea.vmem %s1321_s7, %s911_s9 }
  0x1e   : > { %v1186_v23 = vrot.slane %v567_v20, %v570_v5  ;;  %v1188_v24 = vrot.slane %v567_v20, %v574_v8  ;;  %v587_v25 = vunpack.c.l.bf16 %v585_v22  ;;  %v588_v26 = vunpack.c.h.bf16 %v585_v22  ;;  %s665_s23 = sshll.u32 %s411_s17, 4  ;;  %s1246_s18 = scalar_lea.hbm %s1320_s6, %s912_s15  ;;  %s1239_s23 = int_to_ptr.vmem [resolvable:$true] %s665_s23 }
  0x1f   : > { %v551_v27 = vcombine.low %v549_v18, %v549_v18  ;;  %v554_v28 = vsub.f32 %v547_v12, %v549_v18  ;;  %v497_v29 = vrot.slane %v496_v21, 2  ;;  %v501_v30 = vsub.f32 %v494_v11, %v496_v21  ;;  %s636_s19 = scalar_lea.sflag [#allocation3], %s409_s20  ;;  %s974_s21 = scalar_lea.vmem %s1239_s23, 128 }
  0x20   : > { %vm576_vm1 = vcmp.eq.s32.totalorder %v1186_v23, 1  ;;  %vm577_vm2 = vcmp.eq.s32.totalorder %v1188_v24, 1  ;;  %v591_v31 = vsub.f32 %v544_v15, %v587_v25  ;;  %v592_v32 = vsub.f32 %v545_v16, %v588_v26  ;;  %p975_p12 = scmp.ne.s32.totalorder %s1239_s23, %s974_s21  ;;  %s1054_s22 = smov [#allocation2]  }
  0x21   : > { %v553_v33 = vsub.f32 %v546_v17, %v551_v27  ;;  %v556_v34 = vand.u32 2147483647, %v554_v28  ;;  %v560_v35 = vmul.f32 0.5, %v554_v28  ;;  %v499_v36 = vsub.f32 %v494_v11, %v497_v29  ;;  %s978_s28 = sshll.u32 %s1054_s22, 4  ;;  %s979_s28 = int_to_ptr.vmem [resolvable:$false] %s978_s28 }
  0x22   : > { %v518_v37 = vrot.slane %v501_v30, %v508_v14  ;;  %v595_v38 = vand.u32 2147483647, %v591_v31  ;;  %v603_v39 = vmul.f32 0.5, %v591_v31  ;;  %v596_v40 = vand.u32 2147483647, %v592_v32  ;;  %p976_p13 = pnand %p975_p12, %p1135_p4  ;;  %s980_s9 = scalar_lea.vmem %s979_s28, 256 }
  0x23   : > { %v555_v41 = vand.u32 2147483647, %v553_v33  ;;  %vm1200_vm3 = vcmp.lt.f32.partialorder %v556_v34, 1.0  ;;  %v559_v43 = vmul.f32 0.5, %v553_v33  ;;  %v562_v44 = vmul.f32 %v560_v35, %v554_v28  ;;  %p981_p1 = scmp.lt.s32.totalorder %s1239_s23, %s979_s28  ;;  %p982_p2 = scmp.lt.s32.totalorder %s980_s9, %s974_s21 }
  0x24   : > { %v898_v45 = vadd.f32 -0.5, %v556_v34  ;;  %v509_v46 = vrot.slane %v499_v36, %v508_v14  ;;  %v519_v47 = vcombine.high %v518_v37, %v518_v37  ;;  %vm1205_vm4 = vcmp.lt.f32.partialorder %v595_v38, 1.0  ;;  %p977_p0 = pneg %p976_p13 }
  0x25   : > { %vm1209_vm5 = vcmp.lt.f32.partialorder %v555_v41, 1.0  ;;  %v561_v50 = vmul.f32 %v559_v43, %v553_v33  ;;  %v897_v51 = vadd.f32 -0.5, %v555_v41  ;;  %v607_v52 = vmul.f32 %v603_v39, %v591_v31  ;;  %p983_p3 = por %p982_p2, %p981_p1 }
  0x26   : > { %v566_v53 = vsel %vm1200_vm3, %v562_v44, %v898_v45  ;;  %v1217_v54 = vsel %vm492_vm0, %v509_v46, %v519_v47  ;;  %v899_v55 = vadd.f32 -0.5, %v595_v38  ;;  %vm1231_vm6 = vcmp.lt.f32.partialorder %v596_v40, 1.0 }
  0x27   : > { %v565_v57 = vsel %vm1209_vm5, %v561_v50, %v897_v51  ;;  %v579_v58 = vsel %vm577_vm2, %v566_v53, 0.0  ;;  %v523_v59 = vand.u32 2147483647, %v1217_v54  ;;  %v604_v63 = vmul.f32 0.5, %v592_v32  ;;  %p984_p5 = pnand %p983_p3, %p977_p0 }
  0x28   : > { %v578_v61 = vsel %vm576_vm1, %v565_v57, 0.0  ;;  %v615_v62 = vsel %vm1205_vm4, %v607_v52, %v899_v55  ;;  %v900_v1 = vadd.f32 -0.5, %v596_v40  ;;  %v589_v5 = vunpack.c.l.bf16 %v586_v56 }
  0x29   : > { %v582_v2 = vcombine.high %v578_v61, %v579_v58  ;;  %v524_v3 = vsub.f32 0.0, %v523_v59  ;;  %v619_v4 = vsel %vm576_vm1, %v615_v62, 0.0  ;;  %v608_v6 = vmul.f32 %v604_v63, %v592_v32 }
  0x2a   : > { %623 = vst [vmem:[%s1229_s10] sm:$0xff] %v619_v4  ;;  %v590_v8 = vunpack.c.h.bf16 %v586_v56  ;;  %v593_v10 = vsub.f32 %v546_v17, %v589_v5 }
  0x2b   : > { %584 = vst [vmem:[%s411_s17] sm:$0xff] %v582_v2  ;;  %v525_v9 = vmul.f32 1.442695, %v524_v3  ;;  %v616_v11 = vsel %vm1231_vm6, %v608_v6, %v900_v1 }
  0x2c   : > { %v594_v13 = vsub.f32 %v547_v12, %v590_v8 }
  0x2d   : > { %987 = shalt.err (!%p984_p5)
}
  0x2e   : > { %s988_s17 = scalar_lea.hbm %s1246_s18, 128  ;;  %s992_s30 = scalar_lea.hbm %s1320_s6, 256 }
  0x2f   : > { %p989_p6 = scmp.ne.s32.totalorder %s1246_s18, %s988_s17  ;;  %p993_p10 = scmp.lt.s32.totalorder %s1246_s18, %s1320_s6 }
  0x30   : > { %p994_p11 = scmp.lt.s32.totalorder %s992_s30, %s988_s17 }
  0x31   : > { %p990_p7 = pnand %p989_p6, %p1135_p4 }
  0x32   : > { %p995_p12 = por %p994_p11, %p993_p10 }
  0x33   : > { %p991_p9 = pneg %p990_p7 }
  0x35   : > { %p996_p13 = pnand %p995_p12, %p991_p9 }
  0x37   : > { %999 = shalt.err (!%p996_p13)
}
  0x38   : > { %913 = dma.vmem_to_hbm [thread:$0]  (%p1135_p4), %s1239_s23, 128, %s1246_s18, %s636_s19   ;;  %970 = vpow2.f32 %v525_v9  ;;  %v620_v7 = vsel %vm577_vm2, %v616_v11, 0.0  ;;  %v597_v12 = vand.u32 2147483647, %v593_v10  ;;  %v605_v14 = vmul.f32 0.5, %v593_v10 }
  0x39   : > { %624 = vst [vmem:[%s1229_s10 + $0x8] sm:$0xff] %v620_v7  ;;  %v598_v15 = vand.u32 2147483647, %v594_v13  ;;  %v606_v16 = vmul.f32 0.5, %v594_v13  ;;  %v522_v34 = vmax.f32 %v1217_v54, 0.0  ;;  %s478_s12 = scalar_lea.vmem %s1319_s5, %s1156_s16  ;;  %vm539_vm10 = vcmp.lt.s32.totalorder %v506_v0, 256 }
  0x3a   : > { %vm601_vm7 = vcmp.lt.f32.partialorder %v597_v12, 1.0  ;;  %v609_v17 = vmul.f32 %v605_v14, %v593_v10  ;;  %v901_v18 = vadd.f32 -0.5, %v597_v12 }
  0x3b   : > { %vm602_vm8 = vcmp.lt.f32.partialorder %v598_v15, 1.0  ;;  %v610_v19 = vmul.f32 %v606_v16, %v594_v13  ;;  %v902_v20 = vadd.f32 -0.5, %v598_v15 }
  0x3c   : > { %v617_v21 = vsel %vm601_vm7, %v609_v17, %v901_v18 }
  0x3d   : > { %v621_v22 = vsel %vm576_vm1, %v617_v21, 0.0  ;;  %v618_v25 = vsel %vm602_vm8, %v610_v19, %v902_v20 }
  0x3e   : > { %625 = vst [vmem:[%s1229_s10 + $0x10] sm:$0x3] %v621_v22  ;;  %v622_v26 = vsel %vm577_vm2, %v618_v25, 0.0 }
  0x3f   : > { %626 = vst [vmem:[%s1229_s10 + $0x18] sm:$0x3] %v622_v26 }
  0x45   : > { %v971_v27 = vpop.eup %970 }
  0x46   : > { %v527_v28 = vadd.f32 1.0, %v971_v27  ;;  %v530_v29 = vmul.f32 -0.5, %v971_v27  ;;  %v533_v31 = vand.u32 2147483647, %v971_v27 }
  0x48   : > { %972 = vlog2.f32 %v527_v28  ;;  %v531_v30 = vadd.f32 1.0, %v530_v29  ;;  %vm534_vm9 = vcmp.lt.f32.partialorder %v533_v31, 0.0004427343 }
  0x4a   : > { %v532_v32 = vmul.f32 %v971_v27, %v531_v30 }
  0x55   : > { %v973_v33 = vpop.eup %972 }
  0x56   : > { %v529_v23 = vmul.f32 0.6931472, %v973_v33 }
  0x58   : > { %v535_v35 = vsel %vm534_vm9, %v532_v32, %v529_v23 }
  0x59   : > { %v536_v24 = vadd.f32 %v535_v35, %v522_v34 }
  0x5b   : > { %541 = vst.msk [vmem:[%s478_s12] sm:$0x3] %vm539_vm10, %v536_v24 }
  0x5c PF: > { %p919_p4 = scmp.ge.s32.totalorder %s1050_s29, 2  ;;  %s692_s10 = sand.u32 1, %s1030_s24  }
  0x5d   : > { %s693_s18 = scalar_lea.sflag [#allocation3], %s692_s10 }
  0x5e   : > { %p916_p0 = pnand %p919_p4, %p1142_p8 }
  0x60   : > { %p917_p1 = pneg %p916_p0 }
  0x62   : > { %1025 = dma.done.wait (%p917_p1), %s693_s18, 128  }
  0x63   : > { %1027 = vsyncadd (%p917_p1), %s693_s18, 4294967168  ;;  %s21_s29 = sadd.s32 1, %s1050_s29   ;;  %s1336_s27 = sld [smem:[#allocation5_spill]] }
  0x64   : > { %p18_p2 = scmp.ge.s32.totalorder %s21_s29, 4   ;;  %s1337_s28 = sld [smem:[#allocation6_spill]] }
  0x65   : > { %s1338_s24 = smov %s1034_s25  ;;  %s1339_s25 = smov %s1038_s26 }
  0x66   : > { %s1340_s26 = smov %s1148_s14  ;;  %20 = sbr.rel (!%p18_p2) target bundleno = 4 (0x4), region = 111 }
  0x6b   :  { %710 = vsyncpa [#allocation3], 1 }
  0x6c   :  { %712 = vsyncpa [#allocation3 + $0x1], 1 }

</bundles_post_ra>
